<compile_context>
chip_gen: v7x
topology: tpu7x:2x2x1
jax: 0.10.0
libtpu: 0.0.40
codegen_flags: <defaults>
</compile_context>

<pallas_src>
import functools
import math

import jax
import jax.numpy as jnp
from jax.experimental import pallas as pl
from jax.experimental.pallas import tpu as pltpu

LARGE_NUMBER = 1.0e9


def _pick_block_rows(n: int, multiplier: int) -> int:
    """Largest multiple-of-8 divisor of n//multiplier keeping the
    (block_rows, n) f32 logits tile around <= 2 MiB."""
    base = n // multiplier
    limit = max(8, (2 * 1024 * 1024) // (4 * n))
    limit = min(limit, 512)
    best = None
    c = 8
    while c <= min(base, limit):
        if base % c == 0:
            best = c
        c += 8
    if best is None:
        best = base  # tiny problems: one block covers n//multiplier rows
    return best


def _ntxent_kernel(x1_ref, x2_ref, loss_ref, zf_ref, zh_ref, *,
                   tau: float, multiplier: int, block_rows: int):
    i = pl.program_id(0)
    n, _ = zf_ref.shape
    m = multiplier
    bm = block_rows
    inv_tau = 1.0 / tau

    # ---- one-time init: normalize both halves into resident scratch --------
    @pl.when(i == 0)
    def _init():
        b = x1_ref.shape[0]
        for h, ref in enumerate((x1_ref, x2_ref)):
            x = ref[...].astype(jnp.float32)
            sq = jnp.sum(x * x, axis=1, keepdims=True)
            inv_norm = jax.lax.rsqrt(jnp.maximum(sq, 1e-24))
            zf_ref[pl.ds(h * b, b), :] = x * inv_norm
        zh_ref[...] = zf_ref[...].astype(zh_ref.dtype)   # bf16 copy for MXU
        loss_ref[0, 0] = jnp.float32(0.0)

    # ---- this row block ----------------------------------------------------
    r0 = i * bm
    zr_f = zf_ref[pl.ds(pl.multiple_of(r0, bm), bm), :]        # (bm, D) f32
    zr_h = zr_f.astype(zh_ref.dtype)                            # bf16 for MXU

    # logits tile (bm, n): contract the feature (lane) dim of both operands,
    # no in-kernel transpose of z.  bf16 inputs, f32 accumulation.
    logits = jax.lax.dot_general(
        zr_h, zh_ref[...],
        dimension_numbers=(((1,), (1,)), ((), ())),
        preferred_element_type=jnp.float32) * inv_tau           # (bm, n)

    # mask the diagonal entries that fall inside this tile
    row_ids = r0 + jax.lax.broadcasted_iota(jnp.int32, (bm, n), 0)
    col_ids = jax.lax.broadcasted_iota(jnp.int32, (bm, n), 1)
    logits = jnp.where(col_ids == row_ids, -LARGE_NUMBER, logits)

    # per-row logsumexp (log_softmax denominator)
    row_max = jnp.max(logits, axis=1, keepdims=True)            # (bm, 1)
    sum_exp = jnp.sum(jnp.exp(logits - row_max), axis=1, keepdims=True)
    lse = row_max + jnp.log(sum_exp)                            # (bm, 1)

    # positive-pair logits: rows (r + k*n/m) % n form a contiguous block of z
    # (block_rows divides n/m so it never wraps) -> row-wise dot, no gather.
    pos = jnp.zeros((bm, 1), jnp.float32)
    for k in range(1, m):
        s_raw = r0 + k * (n // m)
        s = jnp.where(s_raw >= n, s_raw - n, s_raw)             # (.) % n
        zp = zf_ref[pl.ds(pl.multiple_of(s, bm), bm), :]        # (bm, D) f32
        pos = pos + jnp.sum(zr_f * zp, axis=1, keepdims=True)
    pos = pos * inv_tau

    # sum over positives of logprob = sum(pos) - (m-1) * sum(lse)
    picked = jnp.sum(pos) - (m - 1) * jnp.sum(lse)
    scale = 1.0 / (n * (m - 1) * 1.0)                           # norm = 1.0
    loss_ref[0, 0] = loss_ref[0, 0] + (-picked) * scale


def ntxent_loss(batch_sample_one, batch_sample_two, tau: float = 1.0,
                multiplier: int = 2):
    """NTXent forward pass. Inputs: (B, D) each. Returns scalar loss."""
    b, d = batch_sample_one.shape
    assert batch_sample_two.shape == (b, d)
    n = 2 * b
    assert multiplier >= 2 and n % multiplier == 0

    bm = _pick_block_rows(n, multiplier)
    grid = (n // bm,)

    kernel = functools.partial(
        _ntxent_kernel, tau=float(tau), multiplier=int(multiplier),
        block_rows=bm)

    out = pl.pallas_call(
        kernel,
        out_shape=jax.ShapeDtypeStruct((1, 1), jnp.float32),
        grid=grid,
        in_specs=[pl.BlockSpec(memory_space=pltpu.MemorySpace.VMEM),
                  pl.BlockSpec(memory_space=pltpu.MemorySpace.VMEM)],
        out_specs=pl.BlockSpec(memory_space=pltpu.MemorySpace.SMEM),
        scratch_shapes=[pltpu.VMEM((n, d), jnp.float32),    # normalized z
                        pltpu.VMEM((n, d), jnp.bfloat16)],  # bf16 copy (MXU)
        compiler_params=pltpu.CompilerParams(
            dimension_semantics=("arbitrary",),
            vmem_limit_bytes=32 * 1024 * 1024),
        cost_estimate=pl.CostEstimate(
            flops=2 * n * n * d,
            transcendentals=n * n + 2 * n,
            bytes_accessed=2 * b * d * 4 + 4),
    )(batch_sample_one, batch_sample_two)
    return out[0, 0]


def _ntxent_ref(x1, x2, tau=1.0, multiplier=2):
    """Pure-JAX reference mirroring the PyTorch module."""
    z = jnp.concatenate([x1, x2], axis=0)
    n = z.shape[0]
    z = z / jnp.maximum(jnp.linalg.norm(z, axis=1, keepdims=True), 1e-12)
    z = z / jnp.sqrt(tau)
    logits = z @ z.T
    logits = logits.at[jnp.arange(n), jnp.arange(n)].set(-LARGE_NUMBER)
    logprob = jax.nn.log_softmax(logits, axis=1)
    m = multiplier
    labels = (jnp.repeat(jnp.arange(n), m) +
              jnp.tile(jnp.arange(m) * (n // m), n)) % n
    labels = labels.reshape(n, m)[:, 1:].reshape(-1)
    rows = jnp.repeat(jnp.arange(n), m - 1)
    return -logprob[rows, labels].sum() / n / (m - 1)


if __name__ == "__main__":
    key = jax.random.PRNGKey(0)
    k1, k2 = jax.random.split(key)
    B, D = 8, 32                      # n = 2*B = 16
    x1 = jax.random.normal(k1, (B, D), dtype=jnp.float32)
    x2 = jax.random.normal(k2, (B, D), dtype=jnp.float32)

    loss = jax.block_until_ready(ntxent_loss(x1, x2, tau=1.0, multiplier=2))
    ref = jax.block_until_ready(_ntxent_ref(x1, x2, tau=1.0, multiplier=2))

    # bf16 MXU inputs -> slightly loosened tolerance (softmax math stays f32)
    assert jnp.allclose(loss, ref, rtol=1e-2, atol=1e-2), (loss, ref)
    print("KERNEL_OK")
</pallas_src>

<mosaic_0001>
module attributes {stable_mosaic.version = 11 : i64} {
  func.func @_ntxent_kernel(%arg0: i32, %arg1: memref<8x32xf32, #tpu.memory_space<vmem>>, %arg2: memref<8x32xf32, #tpu.memory_space<vmem>>, %arg3: memref<1x1xf32, #tpu.memory_space<smem>>, %arg4: memref<16x32xf32, #tpu.memory_space<vmem>>, %arg5: memref<16x32xbf16, #tpu.memory_space<vmem>>) attributes {dimension_semantics = [#tpu.dimension_semantics<arbitrary>], iteration_bounds = array<i64: 2>, scalar_prefetch = 0 : i64, scratch_operands = 2 : i64, tpu.core_type = #tpu.core_type<tc>, window_params = [{pipeline_mode = #tpu.pipeline_mode<synchronous>, transform_indices = @transform_0, window_bounds = array<i64: 8, 32>}, {pipeline_mode = #tpu.pipeline_mode<synchronous>, transform_indices = @transform_1, window_bounds = array<i64: 8, 32>}, {transform_indices = @transform_2, window_bounds = array<i64: 1, 1>}]} {
    %c0_i32 = arith.constant 0 : i32
    %0 = arith.cmpi eq, %arg0, %c0_i32 : i32
    %1 = arith.extui %0 : i1 to i32
    %c0_i32_0 = arith.constant 0 : i32
    %2 = arith.cmpi ne, %1, %c0_i32_0 : i32
    scf.if %2 {
      %c0_22 = arith.constant 0 : index
      %c0_23 = arith.constant 0 : index
      %57 = vector.load %arg1[%c0_22, %c0_23] : memref<8x32xf32, #tpu.memory_space<vmem>>, vector<8x32xf32>
      %58 = arith.mulf %57, %57 : vector<8x32xf32>
      %cst_24 = arith.constant dense<0.000000e+00> : vector<8xf32>
      %59 = vector.multi_reduction <add>, %58, %cst_24 [1] : vector<8x32xf32> to vector<8xf32>
      %60 = vector.shape_cast %59 : vector<8xf32> to vector<8x1xf32>
      %cst_25 = arith.constant 1.000000e-24 : f32
      %61 = vector.broadcast %cst_25 : f32 to vector<8x1xf32>
      %62 = arith.maximumf %60, %61 : vector<8x1xf32>
      %63 = math.rsqrt %62 : vector<8x1xf32>
      %64 = vector.broadcast %63 : vector<8x1xf32> to vector<8x32xf32>
      %65 = arith.mulf %57, %64 : vector<8x32xf32>
      %c0_26 = arith.constant 0 : index
      %c0_27 = arith.constant 0 : index
      %66 = vector.load %arg4[%c0_26, %c0_27] : memref<16x32xf32, #tpu.memory_space<vmem>>, vector<8x32xf32>
      tpu.vector_store %arg4[%c0_26, %c0_27], %65 {strides = array<i32>} : memref<16x32xf32, #tpu.memory_space<vmem>>, vector<8x32xf32>,
      %c0_28 = arith.constant 0 : index
      %c0_29 = arith.constant 0 : index
      %67 = vector.load %arg2[%c0_28, %c0_29] : memref<8x32xf32, #tpu.memory_space<vmem>>, vector<8x32xf32>
      %68 = arith.mulf %67, %67 : vector<8x32xf32>
      %cst_30 = arith.constant dense<0.000000e+00> : vector<8xf32>
      %69 = vector.multi_reduction <add>, %68, %cst_30 [1] : vector<8x32xf32> to vector<8xf32>
      %70 = vector.shape_cast %69 : vector<8xf32> to vector<8x1xf32>
      %cst_31 = arith.constant 1.000000e-24 : f32
      %71 = vector.broadcast %cst_31 : f32 to vector<8x1xf32>
      %72 = arith.maximumf %70, %71 : vector<8x1xf32>
      %73 = math.rsqrt %72 : vector<8x1xf32>
      %74 = vector.broadcast %73 : vector<8x1xf32> to vector<8x32xf32>
      %75 = arith.mulf %67, %74 : vector<8x32xf32>
      %c8 = arith.constant 8 : index
      %c0_32 = arith.constant 0 : index
      %76 = vector.load %arg4[%c8, %c0_32] : memref<16x32xf32, #tpu.memory_space<vmem>>, vector<8x32xf32>
      tpu.vector_store %arg4[%c8, %c0_32], %75 {strides = array<i32>} : memref<16x32xf32, #tpu.memory_space<vmem>>, vector<8x32xf32>,
      %c0_33 = arith.constant 0 : index
      %c0_34 = arith.constant 0 : index
      %77 = vector.load %arg4[%c0_33, %c0_34] : memref<16x32xf32, #tpu.memory_space<vmem>>, vector<16x32xf32>
      %78 = arith.truncf %77 : vector<16x32xf32> to vector<16x32xbf16>
      %c0_35 = arith.constant 0 : index
      %c0_36 = arith.constant 0 : index
      %79 = vector.load %arg5[%c0_35, %c0_36] : memref<16x32xbf16, #tpu.memory_space<vmem>>, vector<16x32xbf16>
      tpu.vector_store %arg5[%c0_35, %c0_36], %78 {strides = array<i32>} : memref<16x32xbf16, #tpu.memory_space<vmem>>, vector<16x32xbf16>,
      %cst_37 = arith.constant 0.000000e+00 : f32
      %c0_38 = arith.constant 0 : index
      %c0_39 = arith.constant 0 : index
      %80 = memref.load %arg3[%c0_38, %c0_39] : memref<1x1xf32, #tpu.memory_space<smem>>
      memref.store %cst_37, %arg3[%c0_38, %c0_39] : memref<1x1xf32, #tpu.memory_space<smem>>
    } else {
    }
    %c8_i32 = arith.constant 8 : i32
    %3 = arith.muli %arg0, %c8_i32 : i32
    %4 = tpu.assume_multiple %3, 8 : i32
    %5 = arith.index_cast %4 : i32 to index
    %c0 = arith.constant 0 : index
    %6 = vector.load %arg4[%5, %c0] : memref<16x32xf32, #tpu.memory_space<vmem>>, vector<8x32xf32>
    %7 = arith.truncf %6 : vector<8x32xf32> to vector<8x32xbf16>
    %c0_1 = arith.constant 0 : index
    %c0_2 = arith.constant 0 : index
    %8 = vector.load %arg5[%c0_1, %c0_2] : memref<16x32xbf16, #tpu.memory_space<vmem>>, vector<16x32xbf16>
    %cst = arith.constant dense<0.000000e+00> : vector<8x16xf32>
    %9 = tpu.matmul %7, %8, %cst {dimension_numbers = #tpu.dot_dimension_numbers<[1], [1], [0], [0], [0, 0, 1, 0], [], []>} : vector<8x32xbf16>, vector<16x32xbf16>, vector<8x16xf32> -> vector<8x16xf32>
    %cst_3 = arith.constant 1.000000e+00 : f32
    %10 = vector.broadcast %cst_3 : f32 to vector<8x16xf32>
    %11 = arith.mulf %9, %10 : vector<8x16xf32>
    %12 = tpu.iota {dimensions = array<i32: 0>} : vector<8x16xi32>
    %13 = vector.broadcast %3 : i32 to vector<8x16xi32>
    %14 = arith.addi %13, %12 : vector<8x16xi32>
    %15 = tpu.iota {dimensions = array<i32: 1>} : vector<8x16xi32>
    %16 = arith.cmpi eq, %15, %14 : vector<8x16xi32>
    %cst_4 = arith.constant -1.000000e+09 : f32
    %17 = vector.broadcast %cst_4 : f32 to vector<8x16xf32>
    %18 = arith.select %16, %17, %11 : vector<8x16xi1>, vector<8x16xf32>
    %cst_5 = arith.constant dense<0xFF800000> : vector<8xf32>
    %19 = vector.multi_reduction <maximumf>, %18, %cst_5 [1] : vector<8x16xf32> to vector<8xf32>
    %20 = vector.shape_cast %19 : vector<8xf32> to vector<8x1xf32>
    %21 = vector.broadcast %20 : vector<8x1xf32> to vector<8x16xf32>
    %22 = arith.subf %18, %21 : vector<8x16xf32>
    %23 = math.exp %22 : vector<8x16xf32>
    %cst_6 = arith.constant dense<0.000000e+00> : vector<8xf32>
    %24 = vector.multi_reduction <add>, %23, %cst_6 [1] : vector<8x16xf32> to vector<8xf32>
    %25 = vector.shape_cast %24 : vector<8xf32> to vector<8x1xf32>
    %26 = math.log %25 : vector<8x1xf32>
    %27 = arith.addf %20, %26 : vector<8x1xf32>
    %cst_7 = arith.constant 0.000000e+00 : f32
    %28 = vector.broadcast %cst_7 : f32 to vector<8x1xf32>
    %c8_i32_8 = arith.constant 8 : i32
    %29 = arith.addi %3, %c8_i32_8 : i32
    %c16_i32 = arith.constant 16 : i32
    %30 = arith.cmpi sge, %29, %c16_i32 : i32
    %c16_i32_9 = arith.constant 16 : i32
    %31 = arith.subi %29, %c16_i32_9 : i32
    %32 = arith.select %30, %31, %29 : i32
    %33 = tpu.assume_multiple %32, 8 : i32
    %34 = arith.index_cast %33 : i32 to index
    %c0_10 = arith.constant 0 : index
    %35 = vector.load %arg4[%34, %c0_10] : memref<16x32xf32, #tpu.memory_space<vmem>>, vector<8x32xf32>
    %36 = arith.mulf %6, %35 : vector<8x32xf32>
    %cst_11 = arith.constant dense<0.000000e+00> : vector<8xf32>
    %37 = vector.multi_reduction <add>, %36, %cst_11 [1] : vector<8x32xf32> to vector<8xf32>
    %38 = vector.shape_cast %37 : vector<8xf32> to vector<8x1xf32>
    %39 = arith.addf %28, %38 : vector<8x1xf32>
    %cst_12 = arith.constant 1.000000e+00 : f32
    %40 = vector.broadcast %cst_12 : f32 to vector<8x1xf32>
    %41 = arith.mulf %39, %40 : vector<8x1xf32>
    %42 = vector.shape_cast %41 : vector<8x1xf32> to vector<1x8x1xf32>
    %cst_13 = arith.constant dense<0.000000e+00> : vector<1xf32>
    %43 = vector.multi_reduction <add>, %42, %cst_13 [1, 2] : vector<1x8x1xf32> to vector<1xf32>
    %44 = vector.shape_cast %43 : vector<1xf32> to vector<1x1x1xf32>
    %45 = vector.extract %44[0, 0, 0] : f32 from vector<1x1x1xf32>
    %46 = vector.shape_cast %27 : vector<8x1xf32> to vector<1x8x1xf32>
    %cst_14 = arith.constant dense<0.000000e+00> : vector<1xf32>
    %47 = vector.multi_reduction <add>, %46, %cst_14 [1, 2] : vector<1x8x1xf32> to vector<1xf32>
    %48 = vector.shape_cast %47 : vector<1xf32> to vector<1x1x1xf32>
    %49 = vector.extract %48[0, 0, 0] : f32 from vector<1x1x1xf32>
    %cst_15 = arith.constant 1.000000e+00 : f32
    %50 = arith.mulf %cst_15, %49 : f32
    %51 = arith.subf %45, %50 : f32
    %c0_16 = arith.constant 0 : index
    %c0_17 = arith.constant 0 : index
    %52 = memref.load %arg3[%c0_16, %c0_17] : memref<1x1xf32, #tpu.memory_space<smem>>
    %cst_18 = arith.constant 0.000000e+00 : f32
    %53 = arith.subf %cst_18, %51 : f32
    %cst_19 = arith.constant 6.250000e-02 : f32
    %54 = arith.mulf %53, %cst_19 : f32
    %55 = arith.addf %52, %54 : f32
    %c0_20 = arith.constant 0 : index
    %c0_21 = arith.constant 0 : index
    %56 = memref.load %arg3[%c0_20, %c0_21] : memref<1x1xf32, #tpu.memory_space<smem>>
    memref.store %55, %arg3[%c0_20, %c0_21] : memref<1x1xf32, #tpu.memory_space<smem>>
    return
  }
  func.func @transform_0(%arg0: i32) -> (i32, i32) {
    %c0_i32 = arith.constant 0 : i32
    %c0_i32_0 = arith.constant 0 : i32
    %c0_i32_1 = arith.constant 0 : i32
    return %c0_i32, %c0_i32_0 : i32, i32
  }
  func.func @transform_1(%arg0: i32) -> (i32, i32) {
    %c0_i32 = arith.constant 0 : i32
    %c0_i32_0 = arith.constant 0 : i32
    %c0_i32_1 = arith.constant 0 : i32
    return %c0_i32, %c0_i32_0 : i32, i32
  }
  func.func @transform_2(%arg0: i32) -> (i32, i32) {
    %c0_i32 = arith.constant 0 : i32
    %c0_i32_0 = arith.constant 0 : i32
    %c0_i32_1 = arith.constant 0 : i32
    return %c0_i32, %c0_i32_0 : i32, i32
  }
}

</mosaic_0001>

<bundles_post_ra>
// kernel: tpu_custom_call.1
= control target key start
LH: loop header
LB: loop body
LE: loop exit
PB: predicated region body
PF: predicated region fallthrough
CT: control target
= control target key end

     0   :  { %7 = vsyncpa [#allocation5], 0  ;;  %s636_s0 = inlined_call_operand.hbm [shape: f32[8,32], index: 0, kind: input, shape index: {}]   ;;  %s637_s1 = inlined_call_operand.hbm [shape: f32[8,32], index: 1, kind: input, shape index: {}]   ;;  %s638_s2 = inlined_call_operand.hbm [shape: f32[1,1], index: 2, kind: output, shape index: {}]  }
   0x1   :  { %8 = vsyncpa [#allocation8], 0 }
   0x2   :  { %9 = vsyncpa [#allocation6], 0  ;;  %s518_s9 = smov 0  }
   0x3 LB: > { %s524_s10 = sadd.s32 4294967295, %s495_s9   ;;  %p337_p0 = scmp.ge.s32.totalorder %s495_s9, 1  ;;  %s495_s9 = sphi %s518_s9, %s15_s9  }
   0x4   : > { %p83_p1 = scmp.lt.s32.totalorder %s495_s9, 3  ;;  %p639_p3 = scmp.eq.s32.totalorder %s524_s10, 0 }
   0x5   : > { %s497_s12 = smov [#allocation4]   ;;  %s498_s14 = smov [#allocation7]  }
   0x6   : > { %p530_p4 = pnand %p337_p0, %p83_p1  ;;  %s96_s13 = sshll.u32 %s497_s12, 4  ;;  %s97_s13 = int_to_ptr.vmem [resolvable:$true] %s96_s13 }
   0x7   : > { %s107_s15 = sshll.u32 %s498_s14, 4  ;;  %s409_s19 = scalar_lea.hbm %s636_s0, 128  ;;  %s542_s15 = int_to_ptr.vmem [resolvable:$true] %s107_s15 }
   0x8   : > { %s641_s11 = scalar_select %p530_p4, 1, 0 }
   0x9   : > { %p374_p5 = pneg %p530_p4  ;;  %p410_p7 = scmp.ne.s32.totalorder %s636_s0, %s409_s19 }
   0xa   : > { %p416_p11 = scmp.lt.u32.totalorder %s409_s19, %s636_s0 }
   0xb   : > { %p538_p6 = pnand %p639_p3, %p374_p5 }
   0xd   : > { %p411_p8 = pneg %p538_p6 }
   0xf   : > { %p412_p9 = pnand %p411_p8, %p410_p7 }
  0x11   : > { %p413_p10 = pneg %p412_p9 }
  0x13   : > { %p418_p12 = pnand %p416_p11, %p413_p10 }
  0x15   : > { %421 = shalt.err (!%p418_p12)
}
  0x16   : > { %s422_s24 = scalar_lea.vmem %s97_s13, 128  ;;  %p430_p5 = scmp.lt.s32.totalorder %s97_s13, %s97_s13 }
  0x17   : > { %p423_p13 = scmp.ne.s32.totalorder %s97_s13, %s422_s24  ;;  %p431_p2 = scmp.lt.s32.totalorder %s422_s24, %s422_s24 }
  0x19   : > { %p425_p0 = pnand %p423_p13, %p411_p8  ;;  %p432_p3 = por %p431_p2, %p430_p5 }
  0x1b   : > { %p426_p1 = pneg %p425_p0 }
  0x1d   : > { %p433_p4 = pnand %p432_p3, %p426_p1 }
  0x1f   : > { %436 = shalt.err (!%p433_p4)
}
  0x20   : > { %377 = dma.hbm_to_vmem [thread:$0]  (!%p538_p6), %s636_s0, 128, %s97_s13, [#allocation5]  }
  0x21   : > { %s437_s29 = scalar_lea.hbm %s637_s1, 128 }
  0x22   : > { %p438_p7 = scmp.ne.s32.totalorder %s637_s1, %s437_s29  ;;  %p444_p4 = scmp.lt.u32.totalorder %s437_s29, %s637_s1 }
  0x24   : > { %p440_p2 = pnand %p438_p7, %p411_p8 }
  0x26   : > { %p441_p3 = pneg %p440_p2 }
  0x28   : > { %p446_p9 = pnand %p444_p4, %p441_p3 }
  0x2a   : > { %449 = shalt.err (!%p446_p9)
}
  0x2b   : > { %s450_s6 = scalar_lea.vmem %s542_s15, 128  ;;  %p458_p13 = scmp.lt.s32.totalorder %s542_s15, %s542_s15 }
  0x2c   : > { %p451_p10 = scmp.ne.s32.totalorder %s542_s15, %s450_s6  ;;  %p459_p0 = scmp.lt.s32.totalorder %s450_s6, %s450_s6 }
  0x2e   : > { %p453_p11 = pnand %p451_p10, %p411_p8  ;;  %p460_p1 = por %p459_p0, %p458_p13 }
  0x30   : > { %p454_p12 = pneg %p453_p11 }
  0x32   : > { %p461_p5 = pnand %p460_p1, %p454_p12 }
  0x34   : > { %464 = shalt.err (!%p461_p5)
}
  0x35   : > { %380 = dma.hbm_to_vmem [thread:$0]  (!%p538_p6), %s637_s1, 128, %s542_s15, [#allocation8]  }
  0x36   : > { %p643_p7 = scmp.ne.s32.totalorder %s641_s11, 0 }
  0x37   : > { %p644_p2 = scmp.eq.s32.totalorder (!%p643_p7), %s524_s10, 0 }
  0x38   : > { %120 = sbr.rel (%p643_p7) target bundleno = 1008 (0x3f0), region = 28 }
  0x3f   : > { %482 = dma.done.wait (%p644_p2), [#allocation5], 128   ;;  %p645_p8 = pmov %p644_p2 }
  0x40   : > { %p646_p3 = pmov %p644_p2 }
  0x41   : > { %484 = vsyncadd (%p645_p8), [#allocation5], 4294967168 }
  0x42   : > { %486 = dma.done.wait (%p646_p3), [#allocation8], 128   ;;  %p647_p4 = pmov %p644_p2 }
  0x43   : > { %p648_p9 = scmp.ne.s32.totalorder %s524_s10, 0 }
  0x44   : > { %488 = vsyncadd (%p647_p4), [#allocation8], 4294967168  ;;  %v141_v0 = vld [vmem:[#allocation4] sm:$0xff] (!%p648_p9)  ;;  %vm143_vm0 = vcmask (!%p648_p9), 261120   ;;  %v151_v1 = vld [vmem:[#allocation7] sm:$0xff] (!%p648_p9)  ;;  %s499_s11 = smov (!%p648_p9), 0.0  }
  0x45   : > { %140 = sbr.rel (%p648_p9) target bundleno = 244 (0xf4), region = 40  ;;  %v142_v2 = vmul.f32 (!%p648_p9), %v141_v0, %v141_v0  ;;  %v152_v3 = vmul.f32 (!%p648_p9), %v151_v1, %v151_v1  ;;  %165 = sst [smem:[#allocation9]] (!%p648_p9), %s499_s11 }
  0x47   : > { %v144_v4 = vsel (!%p648_p9), %vm143_vm0, %v142_v2, 0.0  ;;  %v153_v5 = vsel (!%p648_p9), %vm143_vm0, %v152_v3, 0.0 }
  0x48   : > { %145 = vadd.xlane.f32.xlu0 (!%p648_p9), %v144_v4 }
  0x4c   : > { %154 = vadd.xlane.f32.xlu0 %v153_v5 }
  0xd5   : > { %v146_v6 = vpop.xlane.xlu0 %145 }
  0xd6   : > { %v147_v7 = vmax.f32 %v146_v6, 1e-24 }
  0xd8   : > { %401 = vrsqrt.f32 %v147_v7 }
  0xd9   : > { %v155_v8 = vpop.xlane.xlu0 %154 }
  0xda   : > { %v156_v9 = vmax.f32 %v155_v8, 1e-24 }
  0xdc   : > { %403 = vrsqrt.f32 %v156_v9 }
  0xe2   : > { %v402_v10 = vpop.eup %401 }
  0xe3   : > { %v149_v11 = vmul.f32 %v402_v10, %v141_v0 }
  0xe5   : > { %150 = vst.msk [vmem:[#allocation2] sm:$0xff] %vm143_vm0, %v149_v11 }
  0xe6   : > { %v404_v12 = vpop.eup %403 }
  0xe7   : > { %v158_v13 = vmul.f32 %v404_v12, %v151_v1 }
  0xe9   : > { %159 = vst.msk [vmem:[#allocation2 + $0x8] sm:$0xff] %vm143_vm0, %v158_v13 }
  0xec   : > { %v160_v14 = vld [vmem:[#allocation2] sm:$0xff] }
  0xf0   : > { %v161_v15 = vld [vmem:[#allocation2 + $0x8] sm:$0xff] }
  0xf1   : > { %v162_v16 = vpack.c.bf16 %v161_v15, %v160_v14 }
  0xf3   : > { %163 = vst.msk [vmem:[#allocation3] sm:$0xff] %vm143_vm0, %v162_v16 }
  0xf4 PF: > { %vm171_vm1 = vcmask 261120   ;;  %s609_s12 = sshll.u32 %s524_s10, 3  ;;  %v500_v18 = vmov 0.0   ;;  %vm501_vm2 = vmmov 0   ;;  %v218_v22 = vlaneseq  ;;  %s272_s18 = sld [smem:[#allocation9]] }
  0xf5   : > { %352 = vmatprep.subr.bf16.mxu0 %v500_v18  ;;  %354 = vmatprep.mubr.msk.bf16.mxu0 %vm501_vm2, %v500_v18  ;;  %s167_s13 = scalar_lea.vmem [#allocation2], %s609_s12  ;;  %v220_v24 = vstv %s609_s12  ;;  %vm226_vm4 = vcmask 130048   ;;  %s239_s14 = sadd.s32 8, %s609_s12  ;;  %vm250_vm5 = vcmask 7168  }
  0xf6   : > { %v168_v20 = vld [vmem:[%s167_s13] sm:$0xff]  ;;  %v219_v23 = vshrl.u32 %v218_v22, 7  ;;  %v223_v26 = vand.u32 127, %v218_v22  ;;  %p240_p6 = scmp.ge.s32.totalorder %s239_s14, 16  ;;  %s241_s15 = sadd.s32 4294967288, %s609_s12 }
  0xf7   : > { %v169_v21 = vpack.c.bf16 %v168_v20, %v168_v20  ;;  %p385_p10 = scmp.eq.s32.totalorder %s524_s10, 1  ;;  %s465_s26 = scalar_lea.hbm %s638_s2, 16 }
  0xf8   : > { %v221_v25 = vadd.s32 %v220_v24, %v219_v23  ;;  %s650_s15 = smov (!%p240_p6, %s241_s15), %s239_s14  ;;  %p466_p11 = scmp.ne.s32.totalorder %s638_s2, %s465_s26 }
  0xf9   : > { %s243_s16 = scalar_lea.vmem [#allocation2], %s650_s15  ;;  %p471_p0 = scmp.lt.u32.totalorder %s465_s26, %s638_s2 }
  0xfa   : > { %v170_v17 = vld [vmem:[#allocation3] sm:$0xff]  ;;  %vm224_vm3 = vcmp.eq.s32.totalorder %v223_v26, %v221_v25  ;;  %v244_v33 = vld [vmem:[%s243_s16] sm:$0xff]  ;;  %p467_p12 = pnand %p466_p11, %p385_p10 }
  0xfb   : > { %v176_v19 = vsel %vm171_vm1, %v170_v17, 0  ;;  %v245_v34 = vmul.f32 %v244_v33, %v168_v20 }
  0xfc   : > { %353 = vmatpush3.bf16.xpose.msra.mxu0 %v176_v19  ;;  %p468_p13 = pneg %p467_p12 }
  0xfd   : > { %v246_v35 = vsel %vm171_vm1, %v245_v34, 0.0 }
  0xfe   : > { %247 = vadd.xlane.f32.xlu1 %v246_v35  ;;  %p473_p1 = pnand %p471_p0, %p468_p13 }
 0x103   : > { %355 = vmatmul.mubr.msk.bf16.vlgmr.msra.gmra.mrb[0].mxu0 %vm171_vm1, %v169_v21 }
 0x18b   : > { %v248_v41 = vpop.xlane.xlu1 %247 }
 0x18c   : > { %v251_v42 = vsel %vm250_vm5, %v248_v41, 0.0 }
 0x18d   : > { %252 = vadd.xlane.f32.xlu1 %v251_v42 }
 0x1d6   : > { %v212_v27 = vpop.f32.mrb[0].mxu0 }
 0x1d7   : > { %v225_v28 = vsel %vm224_vm3, -1e+09, %v212_v27  ;;  %v356_v29 = vpop.f32.mrb[1].mxu0 }
 0x1d8   : > { %v215_v30 = vpop.f32.mrb[2].mxu0  ;;  %v227_v31 = vsel %vm226_vm4, %v225_v28, -inf }
 0x1d9   : > { %228 = vmax.xlane.f32.xlu0 %v227_v31  ;;  %v357_v32 = vpop.f32.mrb[3].mxu0 }
 0x21a   : > { %v253_v48 = vpop.xlane.xlu1 %252 }
 0x21b   : > { %v254_v49 = vrot.slane %v253_v48, 4 }
 0x21d   : > { %v255_v50 = vadd.f32 %v254_v49, %v253_v48 }
 0x21f   : > { %v256_v51 = vrot.slane %v255_v50, 2 }
 0x221   : > { %v257_v52 = vadd.f32 %v256_v51, %v255_v50 }
 0x223   : > { %v258_v53 = vrot.slane %v257_v52, 1 }
 0x225   : > { %v259_v54 = vadd.f32 %v258_v53, %v257_v52 }
 0x227   : > { %358 = vpush %v259_v54 }
 0x258   : > { %s359_s17 = spop %358 }
 0x266   : > { %v229_v36 = vpop.xlane.xlu0 %228 }
 0x267   : > { %v230_v37 = vsub.f32 %v225_v28, %v229_v36 }
 0x269   : > { %v231_v38 = vmul.f32 1.442695, %v230_v37 }
 0x26b   : > { %405 = vpow2.f32 %v231_v38 }
 0x275   : > { %v406_v39 = vpop.eup %405 }
 0x276   : > { %v233_v40 = vsel %vm226_vm4, %v406_v39, 0.0 }
 0x277   : > { %234 = vadd.xlane.f32.xlu0 %v233_v40 }
 0x304   : > { %v235_v43 = vpop.xlane.xlu0 %234 }
 0x305   : > { %407 = vlog2.f32 %v235_v43 }
 0x30f   : > { %v408_v44 = vpop.eup %407 }
 0x310   : > { %v237_v45 = vmul.f32 0.6931472, %v408_v44 }
 0x312   : > { %v238_v46 = vadd.f32 %v237_v45, %v229_v36 }
 0x314   : > { %v261_v47 = vsel %vm250_vm5, %v238_v46, 0.0 }
 0x315   : > { %262 = vadd.xlane.f32.xlu0 %v261_v47 }
 0x3a2   : > { %v263_v55 = vpop.xlane.xlu0 %262 }
 0x3a3   : > { %v264_v56 = vrot.slane %v263_v55, 4 }
 0x3a5   : > { %v265_v57 = vadd.f32 %v264_v56, %v263_v55 }
 0x3a7   : > { %v266_v58 = vrot.slane %v265_v57, 2 }
 0x3a9   : > { %v267_v59 = vadd.f32 %v266_v58, %v265_v57 }
 0x3ab   : > { %v268_v60 = vrot.slane %v267_v59, 1 }
 0x3ad   : > { %v269_v61 = vadd.f32 %v268_v60, %v267_v59 }
 0x3af   : > { %360 = vpush %v269_v61 }
 0x3e0   : > { %s361_s19 = spop %360 }
 0x3e1   : > { %s271_s20 = ssub.f32 %s359_s17, %s361_s19 }
 0x3e3   : > { %s273_s21 = ssub.f32 0.0, %s271_s20 }
 0x3e5   : > { %s274_s22 = smul.f32 0.0625, %s273_s21 }
 0x3e7   : > { %s275_s23 = sadd.f32 %s274_s22, %s272_s18 }
 0x3e9   : > { %277 = sst [smem:[#allocation9]] %s275_s23 }
 0x3ea   : > { %476 = shalt.err (!%p473_p1)
}
 0x3eb   : > { %s502_s3 = smov [#allocation9]  }
 0x3ec   : > { %371 = dma.smem_to_hbm (%p385_p10), %s502_s3, 16, %s638_s2, [#allocation6]  }
 0x3ed   : > { %490 = dma.done.wait (%p385_p10), [#allocation6], 16  }
 0x3ee   : > { %492 = vsyncadd (%p385_p10), [#allocation6], 4294967280 }
 0x3ef   : > { %291 = sfence }
 0x3f0 PF: > { %s15_s9 = sadd.s32 1, %s495_s9  }
 0x3f1   : > { %p12_p5 = scmp.ge.s32.totalorder %s15_s9, 4  }
 0x3f3   :  { %14 = sbr.rel (!%p12_p5) target bundleno = 3 (0x3), region = 69 }
 0x3fa   :  { %297 = vsyncpa [#allocation5], 1 }
 0x3fb   :  { %299 = vsyncpa [#allocation5 + $0x1], 1 }
 0x3fc   :  { %300 = vsyncpa [#allocation8], 1 }
 0x3fd   :  { %301 = vsyncpa [#allocation6], 1 }
 0x3fe   :  { %303 = vsyncpa [#allocation6 + $0x1], 1 }

</bundles_post_ra>
